<compile_context>
chip_gen: v5e
topology: v5e:2x2
jax: 0.10.0
libtpu: 0.0.40
codegen_flags: <defaults>
</compile_context>

<pallas_src>
import jax
import jax.numpy as jnp
from jax import lax
from jax.experimental import pallas as pl
from jax.experimental.pallas import tpu as pltpu

_MiB = 1024 * 1024


# ---------------------------------------------------------------------------
# TPU-generation configuration.
# ---------------------------------------------------------------------------

def _tpu_config():
    """Return (block_bytes, vmem_limit_bytes, vpu_channel_threshold).

    v5e/v6e: 128 MiB VMEM -> big blocks and a generous scoped-VMEM limit.
    v7x    :  64 MiB VMEM -> ~4 MiB blocks, <=48 MiB limit, lower VPU cutoff
              (3.2 TB/s HBM leaves only ~10 VALU ops/elem of slack).
    """
    vmem = None
    try:
        vmem = int(pltpu.get_tpu_info().vmem_capacity_bytes)
    except Exception:
        vmem = None
    kind = ""
    try:
        kind = jax.devices()[0].device_kind.lower()
    except Exception:
        pass
    if vmem is None:
        # Conservative fallback (assume the small-VMEM generation) unless the
        # device kind clearly says otherwise.
        vmem = 128 * _MiB if ("v5" in kind or "v6" in kind) else 64 * _MiB

    if vmem < 128 * _MiB:                     # v7x-class
        return 4 * _MiB, 48 * _MiB, 4
    if "v5" in kind:                          # v5e: slower HBM, 4 MiB is enough
        return 4 * _MiB, 64 * _MiB, 8
    return 8 * _MiB, 96 * _MiB, 8             # v6e


def _choose_tiles(N, total, granule, bytes_per_unit, block_bytes):
    """Pick (nb images-per-block, tile along `total`) for a streaming kernel.

    `total` is tiled in multiples of `granule` (128 lanes or 8 sublanes); one
    unit of `total` costs `bytes_per_unit` bytes per image.  Targets
    `block_bytes` per activation block and guarantees >= 2 grid steps when the
    shape allows it (megacore on v7x; neutral on 1-TC chips).
    """
    budget = max(granule, ((block_bytes // bytes_per_unit) // granule) * granule)
    if budget < total:
        return 1, budget                      # already >= 2 tiles along `total`

    tile = total                              # whole extent fits in one block
    nb = max(1, min(N, block_bytes // (bytes_per_unit * total)))
    if -(-N // nb) >= 2:
        return nb, tile

    # Grid would collapse to a single step: split spatially (preferred) or on
    # the batch so both TensorCores get work.
    if total >= 2 * granule:
        half = -(-(-(-total // 2)) // granule) * granule
        if half < total:
            tile = half
        else:
            t2 = (total // 2 // granule) * granule
            if t2 >= granule:
                tile = t2
    elif N >= 2:
        nb = -(-N // 2)
    return nb, tile


# ---------------------------------------------------------------------------
# Kernels.
# ---------------------------------------------------------------------------

def _residual_pw_mxu_kernel(x_ref, w_ref, b_ref, o_ref):
    """General path.  Blocks:
         x_ref/o_ref : (nb, C, T)  -- channels on sublanes, spatial on lanes
         w_ref       : (C, C)      -- folded weight W' = W + I
         b_ref       : (C, 1)      -- bias column (broadcasts over lanes)
       out = W' @ x + b on the MXU, unrolled over the nb images in the block.
    """
    w = w_ref[...]
    b = b_ref[...]
    for i in range(x_ref.shape[0]):           # static images-per-block unroll
        y = jnp.dot(w, x_ref[i], preferred_element_type=jnp.float32)
        o_ref[i] = (y + b).astype(o_ref.dtype)


def _residual_pw_vpu_packed_kernel(x_ref, w_ref, b_ref, o_ref):
    """Tiny-C path.  Blocks:
         x_ref/o_ref : (nb, C, S, 128) -- per-channel dense (8,128)-tiled slabs
         w_ref       : (C, C)          -- folded weight W' = W + I
         b_ref       : (C, 1)
       C is tiny, so each output channel is a short chain of broadcast FMAs on
       the VPU; the accumulator is seeded from bias + the first FMA (no zeros
       pass, no separate +bias pass).
    """
    w = w_ref[...]
    b = b_ref[...]
    nb, C = x_ref.shape[0], x_ref.shape[1]
    for i in range(nb):                       # static unrolls (nb, C small)
        for co in range(C):
            acc = b[co:co + 1, :1] + w[co:co + 1, :1] * x_ref[i, 0]
            for ci in range(1, C):
                acc = acc + w[co:co + 1, ci:ci + 1] * x_ref[i, ci]
            o_ref[i, co] = acc.astype(o_ref.dtype)


# ---------------------------------------------------------------------------
# Wrapper.
# ---------------------------------------------------------------------------

def residual_pointwise_conv(x_nchw, weight, bias, *, donate_input=False):
    """Residual(Conv2d(C, C, kernel_size=1))(x) == x + conv1x1(x), NCHW in/out.

    x_nchw : (N, C, H, W) float32
    weight : (C, C, 1, 1) float32   (PyTorch Conv2d weight layout)
    bias   : (C,) float32
    donate_input : alias x to the output (saves one HBM allocation) when x is
                   dead after this Residual.
    """
    N, C, H, W = x_nchw.shape
    assert weight.shape == (C, C, 1, 1)
    hw = H * W

    block_bytes, vmem_limit, vpu_max_c = _tpu_config()

    # Fold the residual into the weight:  out = (W + I) @ x + b.
    w_fold = weight.reshape(C, C) + jnp.eye(C, dtype=weight.dtype)
    b_col = bias.reshape(C, 1)

    aliases = {0: 0} if donate_input else {}
    cparams = pltpu.CompilerParams(
        dimension_semantics=("parallel", "parallel"),
        vmem_limit_bytes=vmem_limit,
    )

    # ---- tiny-C path: sublane-packed dense slabs, VPU broadcast FMAs -------
    if C <= vpu_max_c and hw % 128 == 0:
        s_total = hw // 128
        nb, s_blk = _choose_tiles(N, s_total, 8, C * 128 * 4, block_bytes)
        x4 = x_nchw.reshape(N, C, s_total, 128)          # free reshape
        grid = (pl.cdiv(s_total, s_blk), pl.cdiv(N, nb))
        out4 = pl.pallas_call(
            _residual_pw_vpu_packed_kernel,
            out_shape=jax.ShapeDtypeStruct((N, C, s_total, 128), x4.dtype),
            grid_spec=pltpu.PrefetchScalarGridSpec(
                num_scalar_prefetch=0,
                grid=grid,
                in_specs=[
                    pl.BlockSpec((nb, C, s_blk, 128), lambda j, n: (n, 0, j, 0)),
                    pl.BlockSpec((C, C), lambda j, n: (0, 0)),   # W' (resident)
                    pl.BlockSpec((C, 1), lambda j, n: (0, 0)),   # bias (resident)
                ],
                out_specs=pl.BlockSpec((nb, C, s_blk, 128),
                                       lambda j, n: (n, 0, j, 0)),
            ),
            compiler_params=cparams,
            input_output_aliases=aliases,
        )(x4, w_fold, b_col)
        return out4.reshape(N, C, H, W)

    # ---- general path: channels on sublanes, MXU matmul --------------------
    nb, t = _choose_tiles(N, hw, 128, C * 4, block_bytes)
    x3 = x_nchw.reshape(N, C, hw)                         # free reshape
    grid = (pl.cdiv(hw, t), pl.cdiv(N, nb))
    out3 = pl.pallas_call(
        _residual_pw_mxu_kernel,
        out_shape=jax.ShapeDtypeStruct((N, C, hw), x3.dtype),
        grid_spec=pltpu.PrefetchScalarGridSpec(
            num_scalar_prefetch=0,
            grid=grid,
            in_specs=[
                pl.BlockSpec((nb, C, t), lambda j, n: (n, 0, j)),
                pl.BlockSpec((C, C), lambda j, n: (0, 0)),        # W' (resident)
                pl.BlockSpec((C, 1), lambda j, n: (0, 0)),        # bias (resident)
            ],
            out_specs=pl.BlockSpec((nb, C, t), lambda j, n: (n, 0, j)),
        ),
        compiler_params=cparams,
        input_output_aliases=aliases,
    )(x3, w_fold, b_col)
    return out3.reshape(N, C, H, W)


def _reference(x_nchw, weight, bias):
    """Pure-JAX reference: x + conv1x1(x), NCHW semantics (full f32 precision)."""
    N, C, H, W = x_nchw.shape
    w2 = weight.reshape(C, C)
    y = jnp.einsum('oc,nchw->nohw', w2, x_nchw,
                   precision=lax.Precision.HIGHEST)
    return x_nchw + y + bias[None, :, None, None]


if __name__ == "__main__":
    keys = jax.random.split(jax.random.PRNGKey(0), 9)

    # --- Small-C demo shape (sublane-packed VPU path) -----------------------
    N, C, H, W = 2, 4, 16, 16
    x = jax.random.normal(keys[0], (N, C, H, W), dtype=jnp.float32)
    weight = jax.random.normal(keys[1], (C, C, 1, 1), dtype=jnp.float32) * 0.1
    bias = jax.random.normal(keys[2], (C,), dtype=jnp.float32) * 0.1

    out = residual_pointwise_conv(x, weight, bias)
    jax.block_until_ready(out)
    ref = _reference(x, weight, bias)
    assert out.shape == (N, C, H, W)
    assert jnp.allclose(out, ref, atol=1e-4, rtol=1e-4), "tiny-C path mismatch"

    # --- EdgeViT-like channel count (MXU path, batch-blocked grid) ----------
    N2, C2, H2, W2 = 2, 64, 8, 16
    x2 = jax.random.normal(keys[3], (N2, C2, H2, W2), dtype=jnp.float32)
    w2 = jax.random.normal(keys[4], (C2, C2, 1, 1), dtype=jnp.float32) * 0.05
    b2 = jax.random.normal(keys[5], (C2,), dtype=jnp.float32) * 0.05

    out2 = residual_pointwise_conv(x2, w2, b2)
    jax.block_until_ready(out2)
    ref2 = _reference(x2, w2, b2)
    assert out2.shape == (N2, C2, H2, W2)
    assert jnp.allclose(out2, ref2, atol=1e-4, rtol=1e-4), "MXU path mismatch"

    # --- Single-image, larger spatial extent (spatial-split megacore grid) --
    N3, C3, H3, W3 = 1, 64, 32, 32
    x3 = jax.random.normal(keys[6], (N3, C3, H3, W3), dtype=jnp.float32)
    w3 = jax.random.normal(keys[7], (C3, C3, 1, 1), dtype=jnp.float32) * 0.05
    b3 = jax.random.normal(keys[8], (C3,), dtype=jnp.float32) * 0.05

    out3 = residual_pointwise_conv(x3, w3, b3)
    jax.block_until_ready(out3)
    ref3 = _reference(x3, w3, b3)
    assert out3.shape == (N3, C3, H3, W3)
    assert jnp.allclose(out3, ref3, atol=1e-4, rtol=1e-4), "spatial-split mismatch"

    print("KERNEL_OK")
</pallas_src>

<mosaic_0001>
module attributes {stable_mosaic.version = 11 : i64} {
  func.func @_residual_pw_vpu_packed_kernel(%arg0: i32, %arg1: i32, %arg2: memref<1x4x2x128xf32, #tpu.memory_space<vmem>>, %arg3: memref<4x4xf32, #tpu.memory_space<vmem>>, %arg4: memref<4x1xf32, #tpu.memory_space<vmem>>, %arg5: memref<1x4x2x128xf32, #tpu.memory_space<vmem>>) attributes {dimension_semantics = [#tpu.dimension_semantics<parallel>, #tpu.dimension_semantics<parallel>], iteration_bounds = array<i64: 1, 2>, scalar_prefetch = 0 : i64, scratch_operands = 0 : i64, tpu.core_type = #tpu.core_type<tc>, window_params = [{transform_indices = @transform_0, window_bounds = array<i64: 1, 4, 2, 128>}, {pipeline_mode = #tpu.pipeline_mode<synchronous>, transform_indices = @transform_1, window_bounds = array<i64: 4, 4>}, {pipeline_mode = #tpu.pipeline_mode<synchronous>, transform_indices = @transform_2, window_bounds = array<i64: 4, 1>}, {transform_indices = @transform_3, window_bounds = array<i64: 1, 4, 2, 128>}]} {
    %c0 = arith.constant 0 : index
    %c0_0 = arith.constant 0 : index
    %0 = vector.load %arg3[%c0, %c0_0] : memref<4x4xf32, #tpu.memory_space<vmem>>, vector<4x4xf32>
    %c0_1 = arith.constant 0 : index
    %c0_2 = arith.constant 0 : index
    %1 = vector.load %arg4[%c0_1, %c0_2] : memref<4x1xf32, #tpu.memory_space<vmem>>, vector<4x1xf32>
    %2 = vector.extract_strided_slice %1 {offsets = [0, 0], sizes = [1, 1], strides = [1, 1]} : vector<4x1xf32> to vector<1x1xf32>
    %3 = vector.extract_strided_slice %0 {offsets = [0, 0], sizes = [1, 1], strides = [1, 1]} : vector<4x4xf32> to vector<1x1xf32>
    %c0_3 = arith.constant 0 : index
    %c0_4 = arith.constant 0 : index
    %c0_5 = arith.constant 0 : index
    %c0_6 = arith.constant 0 : index
    %4 = vector.load %arg2[%c0_3, %c0_4, %c0_5, %c0_6] : memref<1x4x2x128xf32, #tpu.memory_space<vmem>>, vector<1x1x2x128xf32>
    %5 = vector.shape_cast %4 : vector<1x1x2x128xf32> to vector<2x128xf32>
    %6 = vector.broadcast %3 : vector<1x1xf32> to vector<2x128xf32>
    %7 = arith.mulf %6, %5 : vector<2x128xf32>
    %8 = vector.broadcast %2 : vector<1x1xf32> to vector<2x128xf32>
    %9 = arith.addf %8, %7 : vector<2x128xf32>
    %10 = vector.extract_strided_slice %0 {offsets = [0, 1], sizes = [1, 1], strides = [1, 1]} : vector<4x4xf32> to vector<1x1xf32>
    %c0_7 = arith.constant 0 : index
    %c1 = arith.constant 1 : index
    %c0_8 = arith.constant 0 : index
    %c0_9 = arith.constant 0 : index
    %11 = vector.load %arg2[%c0_7, %c1, %c0_8, %c0_9] : memref<1x4x2x128xf32, #tpu.memory_space<vmem>>, vector<1x1x2x128xf32>
    %12 = vector.shape_cast %11 : vector<1x1x2x128xf32> to vector<2x128xf32>
    %13 = vector.broadcast %10 : vector<1x1xf32> to vector<2x128xf32>
    %14 = arith.mulf %13, %12 : vector<2x128xf32>
    %15 = arith.addf %9, %14 : vector<2x128xf32>
    %16 = vector.extract_strided_slice %0 {offsets = [0, 2], sizes = [1, 1], strides = [1, 1]} : vector<4x4xf32> to vector<1x1xf32>
    %c0_10 = arith.constant 0 : index
    %c2 = arith.constant 2 : index
    %c0_11 = arith.constant 0 : index
    %c0_12 = arith.constant 0 : index
    %17 = vector.load %arg2[%c0_10, %c2, %c0_11, %c0_12] : memref<1x4x2x128xf32, #tpu.memory_space<vmem>>, vector<1x1x2x128xf32>
    %18 = vector.shape_cast %17 : vector<1x1x2x128xf32> to vector<2x128xf32>
    %19 = vector.broadcast %16 : vector<1x1xf32> to vector<2x128xf32>
    %20 = arith.mulf %19, %18 : vector<2x128xf32>
    %21 = arith.addf %15, %20 : vector<2x128xf32>
    %22 = vector.extract_strided_slice %0 {offsets = [0, 3], sizes = [1, 1], strides = [1, 1]} : vector<4x4xf32> to vector<1x1xf32>
    %c0_13 = arith.constant 0 : index
    %c3 = arith.constant 3 : index
    %c0_14 = arith.constant 0 : index
    %c0_15 = arith.constant 0 : index
    %23 = vector.load %arg2[%c0_13, %c3, %c0_14, %c0_15] : memref<1x4x2x128xf32, #tpu.memory_space<vmem>>, vector<1x1x2x128xf32>
    %24 = vector.shape_cast %23 : vector<1x1x2x128xf32> to vector<2x128xf32>
    %25 = vector.broadcast %22 : vector<1x1xf32> to vector<2x128xf32>
    %26 = arith.mulf %25, %24 : vector<2x128xf32>
    %27 = arith.addf %21, %26 : vector<2x128xf32>
    %c0_16 = arith.constant 0 : index
    %c0_17 = arith.constant 0 : index
    %c0_18 = arith.constant 0 : index
    %c0_19 = arith.constant 0 : index
    %28 = vector.load %arg5[%c0_16, %c0_17, %c0_18, %c0_19] : memref<1x4x2x128xf32, #tpu.memory_space<vmem>>, vector<1x1x2x128xf32>
    %29 = vector.shape_cast %28 : vector<1x1x2x128xf32> to vector<2x128xf32>
    %30 = vector.shape_cast %27 : vector<2x128xf32> to vector<1x1x2x128xf32>
    tpu.vector_store %arg5[%c0_16, %c0_17, %c0_18, %c0_19], %30 {strides = array<i32>} : memref<1x4x2x128xf32, #tpu.memory_space<vmem>>, vector<1x1x2x128xf32>,
    %31 = vector.extract_strided_slice %1 {offsets = [1, 0], sizes = [1, 1], strides = [1, 1]} : vector<4x1xf32> to vector<1x1xf32>
    %32 = vector.extract_strided_slice %0 {offsets = [1, 0], sizes = [1, 1], strides = [1, 1]} : vector<4x4xf32> to vector<1x1xf32>
    %c0_20 = arith.constant 0 : index
    %c0_21 = arith.constant 0 : index
    %c0_22 = arith.constant 0 : index
    %c0_23 = arith.constant 0 : index
    %33 = vector.load %arg2[%c0_20, %c0_21, %c0_22, %c0_23] : memref<1x4x2x128xf32, #tpu.memory_space<vmem>>, vector<1x1x2x128xf32>
    %34 = vector.shape_cast %33 : vector<1x1x2x128xf32> to vector<2x128xf32>
    %35 = vector.broadcast %32 : vector<1x1xf32> to vector<2x128xf32>
    %36 = arith.mulf %35, %34 : vector<2x128xf32>
    %37 = vector.broadcast %31 : vector<1x1xf32> to vector<2x128xf32>
    %38 = arith.addf %37, %36 : vector<2x128xf32>
    %39 = vector.extract_strided_slice %0 {offsets = [1, 1], sizes = [1, 1], strides = [1, 1]} : vector<4x4xf32> to vector<1x1xf32>
    %c0_24 = arith.constant 0 : index
    %c1_25 = arith.constant 1 : index
    %c0_26 = arith.constant 0 : index
    %c0_27 = arith.constant 0 : index
    %40 = vector.load %arg2[%c0_24, %c1_25, %c0_26, %c0_27] : memref<1x4x2x128xf32, #tpu.memory_space<vmem>>, vector<1x1x2x128xf32>
    %41 = vector.shape_cast %40 : vector<1x1x2x128xf32> to vector<2x128xf32>
    %42 = vector.broadcast %39 : vector<1x1xf32> to vector<2x128xf32>
    %43 = arith.mulf %42, %41 : vector<2x128xf32>
    %44 = arith.addf %38, %43 : vector<2x128xf32>
    %45 = vector.extract_strided_slice %0 {offsets = [1, 2], sizes = [1, 1], strides = [1, 1]} : vector<4x4xf32> to vector<1x1xf32>
    %c0_28 = arith.constant 0 : index
    %c2_29 = arith.constant 2 : index
    %c0_30 = arith.constant 0 : index
    %c0_31 = arith.constant 0 : index
    %46 = vector.load %arg2[%c0_28, %c2_29, %c0_30, %c0_31] : memref<1x4x2x128xf32, #tpu.memory_space<vmem>>, vector<1x1x2x128xf32>
    %47 = vector.shape_cast %46 : vector<1x1x2x128xf32> to vector<2x128xf32>
    %48 = vector.broadcast %45 : vector<1x1xf32> to vector<2x128xf32>
    %49 = arith.mulf %48, %47 : vector<2x128xf32>
    %50 = arith.addf %44, %49 : vector<2x128xf32>
    %51 = vector.extract_strided_slice %0 {offsets = [1, 3], sizes = [1, 1], strides = [1, 1]} : vector<4x4xf32> to vector<1x1xf32>
    %c0_32 = arith.constant 0 : index
    %c3_33 = arith.constant 3 : index
    %c0_34 = arith.constant 0 : index
    %c0_35 = arith.constant 0 : index
    %52 = vector.load %arg2[%c0_32, %c3_33, %c0_34, %c0_35] : memref<1x4x2x128xf32, #tpu.memory_space<vmem>>, vector<1x1x2x128xf32>
    %53 = vector.shape_cast %52 : vector<1x1x2x128xf32> to vector<2x128xf32>
    %54 = vector.broadcast %51 : vector<1x1xf32> to vector<2x128xf32>
    %55 = arith.mulf %54, %53 : vector<2x128xf32>
    %56 = arith.addf %50, %55 : vector<2x128xf32>
    %c0_36 = arith.constant 0 : index
    %c1_37 = arith.constant 1 : index
    %c0_38 = arith.constant 0 : index
    %c0_39 = arith.constant 0 : index
    %57 = vector.load %arg5[%c0_36, %c1_37, %c0_38, %c0_39] : memref<1x4x2x128xf32, #tpu.memory_space<vmem>>, vector<1x1x2x128xf32>
    %58 = vector.shape_cast %57 : vector<1x1x2x128xf32> to vector<2x128xf32>
    %59 = vector.shape_cast %56 : vector<2x128xf32> to vector<1x1x2x128xf32>
    tpu.vector_store %arg5[%c0_36, %c1_37, %c0_38, %c0_39], %59 {strides = array<i32>} : memref<1x4x2x128xf32, #tpu.memory_space<vmem>>, vector<1x1x2x128xf32>,
    %60 = vector.extract_strided_slice %1 {offsets = [2, 0], sizes = [1, 1], strides = [1, 1]} : vector<4x1xf32> to vector<1x1xf32>
    %61 = vector.extract_strided_slice %0 {offsets = [2, 0], sizes = [1, 1], strides = [1, 1]} : vector<4x4xf32> to vector<1x1xf32>
    %c0_40 = arith.constant 0 : index
    %c0_41 = arith.constant 0 : index
    %c0_42 = arith.constant 0 : index
    %c0_43 = arith.constant 0 : index
    %62 = vector.load %arg2[%c0_40, %c0_41, %c0_42, %c0_43] : memref<1x4x2x128xf32, #tpu.memory_space<vmem>>, vector<1x1x2x128xf32>
    %63 = vector.shape_cast %62 : vector<1x1x2x128xf32> to vector<2x128xf32>
    %64 = vector.broadcast %61 : vector<1x1xf32> to vector<2x128xf32>
    %65 = arith.mulf %64, %63 : vector<2x128xf32>
    %66 = vector.broadcast %60 : vector<1x1xf32> to vector<2x128xf32>
    %67 = arith.addf %66, %65 : vector<2x128xf32>
    %68 = vector.extract_strided_slice %0 {offsets = [2, 1], sizes = [1, 1], strides = [1, 1]} : vector<4x4xf32> to vector<1x1xf32>
    %c0_44 = arith.constant 0 : index
    %c1_45 = arith.constant 1 : index
    %c0_46 = arith.constant 0 : index
    %c0_47 = arith.constant 0 : index
    %69 = vector.load %arg2[%c0_44, %c1_45, %c0_46, %c0_47] : memref<1x4x2x128xf32, #tpu.memory_space<vmem>>, vector<1x1x2x128xf32>
    %70 = vector.shape_cast %69 : vector<1x1x2x128xf32> to vector<2x128xf32>
    %71 = vector.broadcast %68 : vector<1x1xf32> to vector<2x128xf32>
    %72 = arith.mulf %71, %70 : vector<2x128xf32>
    %73 = arith.addf %67, %72 : vector<2x128xf32>
    %74 = vector.extract_strided_slice %0 {offsets = [2, 2], sizes = [1, 1], strides = [1, 1]} : vector<4x4xf32> to vector<1x1xf32>
    %c0_48 = arith.constant 0 : index
    %c2_49 = arith.constant 2 : index
    %c0_50 = arith.constant 0 : index
    %c0_51 = arith.constant 0 : index
    %75 = vector.load %arg2[%c0_48, %c2_49, %c0_50, %c0_51] : memref<1x4x2x128xf32, #tpu.memory_space<vmem>>, vector<1x1x2x128xf32>
    %76 = vector.shape_cast %75 : vector<1x1x2x128xf32> to vector<2x128xf32>
    %77 = vector.broadcast %74 : vector<1x1xf32> to vector<2x128xf32>
    %78 = arith.mulf %77, %76 : vector<2x128xf32>
    %79 = arith.addf %73, %78 : vector<2x128xf32>
    %80 = vector.extract_strided_slice %0 {offsets = [2, 3], sizes = [1, 1], strides = [1, 1]} : vector<4x4xf32> to vector<1x1xf32>
    %c0_52 = arith.constant 0 : index
    %c3_53 = arith.constant 3 : index
    %c0_54 = arith.constant 0 : index
    %c0_55 = arith.constant 0 : index
    %81 = vector.load %arg2[%c0_52, %c3_53, %c0_54, %c0_55] : memref<1x4x2x128xf32, #tpu.memory_space<vmem>>, vector<1x1x2x128xf32>
    %82 = vector.shape_cast %81 : vector<1x1x2x128xf32> to vector<2x128xf32>
    %83 = vector.broadcast %80 : vector<1x1xf32> to vector<2x128xf32>
    %84 = arith.mulf %83, %82 : vector<2x128xf32>
    %85 = arith.addf %79, %84 : vector<2x128xf32>
    %c0_56 = arith.constant 0 : index
    %c2_57 = arith.constant 2 : index
    %c0_58 = arith.constant 0 : index
    %c0_59 = arith.constant 0 : index
    %86 = vector.load %arg5[%c0_56, %c2_57, %c0_58, %c0_59] : memref<1x4x2x128xf32, #tpu.memory_space<vmem>>, vector<1x1x2x128xf32>
    %87 = vector.shape_cast %86 : vector<1x1x2x128xf32> to vector<2x128xf32>
    %88 = vector.shape_cast %85 : vector<2x128xf32> to vector<1x1x2x128xf32>
    tpu.vector_store %arg5[%c0_56, %c2_57, %c0_58, %c0_59], %88 {strides = array<i32>} : memref<1x4x2x128xf32, #tpu.memory_space<vmem>>, vector<1x1x2x128xf32>,
    %89 = vector.extract_strided_slice %1 {offsets = [3, 0], sizes = [1, 1], strides = [1, 1]} : vector<4x1xf32> to vector<1x1xf32>
    %90 = vector.extract_strided_slice %0 {offsets = [3, 0], sizes = [1, 1], strides = [1, 1]} : vector<4x4xf32> to vector<1x1xf32>
    %c0_60 = arith.constant 0 : index
    %c0_61 = arith.constant 0 : index
    %c0_62 = arith.constant 0 : index
    %c0_63 = arith.constant 0 : index
    %91 = vector.load %arg2[%c0_60, %c0_61, %c0_62, %c0_63] : memref<1x4x2x128xf32, #tpu.memory_space<vmem>>, vector<1x1x2x128xf32>
    %92 = vector.shape_cast %91 : vector<1x1x2x128xf32> to vector<2x128xf32>
    %93 = vector.broadcast %90 : vector<1x1xf32> to vector<2x128xf32>
    %94 = arith.mulf %93, %92 : vector<2x128xf32>
    %95 = vector.broadcast %89 : vector<1x1xf32> to vector<2x128xf32>
    %96 = arith.addf %95, %94 : vector<2x128xf32>
    %97 = vector.extract_strided_slice %0 {offsets = [3, 1], sizes = [1, 1], strides = [1, 1]} : vector<4x4xf32> to vector<1x1xf32>
    %c0_64 = arith.constant 0 : index
    %c1_65 = arith.constant 1 : index
    %c0_66 = arith.constant 0 : index
    %c0_67 = arith.constant 0 : index
    %98 = vector.load %arg2[%c0_64, %c1_65, %c0_66, %c0_67] : memref<1x4x2x128xf32, #tpu.memory_space<vmem>>, vector<1x1x2x128xf32>
    %99 = vector.shape_cast %98 : vector<1x1x2x128xf32> to vector<2x128xf32>
    %100 = vector.broadcast %97 : vector<1x1xf32> to vector<2x128xf32>
    %101 = arith.mulf %100, %99 : vector<2x128xf32>
    %102 = arith.addf %96, %101 : vector<2x128xf32>
    %103 = vector.extract_strided_slice %0 {offsets = [3, 2], sizes = [1, 1], strides = [1, 1]} : vector<4x4xf32> to vector<1x1xf32>
    %c0_68 = arith.constant 0 : index
    %c2_69 = arith.constant 2 : index
    %c0_70 = arith.constant 0 : index
    %c0_71 = arith.constant 0 : index
    %104 = vector.load %arg2[%c0_68, %c2_69, %c0_70, %c0_71] : memref<1x4x2x128xf32, #tpu.memory_space<vmem>>, vector<1x1x2x128xf32>
    %105 = vector.shape_cast %104 : vector<1x1x2x128xf32> to vector<2x128xf32>
    %106 = vector.broadcast %103 : vector<1x1xf32> to vector<2x128xf32>
    %107 = arith.mulf %106, %105 : vector<2x128xf32>
    %108 = arith.addf %102, %107 : vector<2x128xf32>
    %109 = vector.extract_strided_slice %0 {offsets = [3, 3], sizes = [1, 1], strides = [1, 1]} : vector<4x4xf32> to vector<1x1xf32>
    %c0_72 = arith.constant 0 : index
    %c3_73 = arith.constant 3 : index
    %c0_74 = arith.constant 0 : index
    %c0_75 = arith.constant 0 : index
    %110 = vector.load %arg2[%c0_72, %c3_73, %c0_74, %c0_75] : memref<1x4x2x128xf32, #tpu.memory_space<vmem>>, vector<1x1x2x128xf32>
    %111 = vector.shape_cast %110 : vector<1x1x2x128xf32> to vector<2x128xf32>
    %112 = vector.broadcast %109 : vector<1x1xf32> to vector<2x128xf32>
    %113 = arith.mulf %112, %111 : vector<2x128xf32>
    %114 = arith.addf %108, %113 : vector<2x128xf32>
    %c0_76 = arith.constant 0 : index
    %c3_77 = arith.constant 3 : index
    %c0_78 = arith.constant 0 : index
    %c0_79 = arith.constant 0 : index
    %115 = vector.load %arg5[%c0_76, %c3_77, %c0_78, %c0_79] : memref<1x4x2x128xf32, #tpu.memory_space<vmem>>, vector<1x1x2x128xf32>
    %116 = vector.shape_cast %115 : vector<1x1x2x128xf32> to vector<2x128xf32>
    %117 = vector.shape_cast %114 : vector<2x128xf32> to vector<1x1x2x128xf32>
    tpu.vector_store %arg5[%c0_76, %c3_77, %c0_78, %c0_79], %117 {strides = array<i32>} : memref<1x4x2x128xf32, #tpu.memory_space<vmem>>, vector<1x1x2x128xf32>,
    return
  }
  func.func @transform_0(%arg0: i32, %arg1: i32) -> (i32, i32, i32, i32) {
    %c0_i32 = arith.constant 0 : i32
    %c0_i32_0 = arith.constant 0 : i32
    %c0_i32_1 = arith.constant 0 : i32
    return %arg1, %c0_i32, %arg0, %c0_i32_0 : i32, i32, i32, i32
  }
  func.func @transform_1(%arg0: i32, %arg1: i32) -> (i32, i32) {
    %c0_i32 = arith.constant 0 : i32
    %c0_i32_0 = arith.constant 0 : i32
    %c0_i32_1 = arith.constant 0 : i32
    return %c0_i32, %c0_i32_0 : i32, i32
  }
  func.func @transform_2(%arg0: i32, %arg1: i32) -> (i32, i32) {
    %c0_i32 = arith.constant 0 : i32
    %c0_i32_0 = arith.constant 0 : i32
    %c0_i32_1 = arith.constant 0 : i32
    return %c0_i32, %c0_i32_0 : i32, i32
  }
  func.func @transform_3(%arg0: i32, %arg1: i32) -> (i32, i32, i32, i32) {
    %c0_i32 = arith.constant 0 : i32
    %c0_i32_0 = arith.constant 0 : i32
    %c0_i32_1 = arith.constant 0 : i32
    return %arg1, %c0_i32, %arg0, %c0_i32_0 : i32, i32, i32, i32
  }
}

</mosaic_0001>

<bundles_post_ra>
// kernel: tpu_custom_call.1
= control target key start
LH: loop header
LB: loop body
LE: loop exit
PB: predicated region body
PF: predicated region fallthrough
CT: control target
= control target key end

     0   :  { %8 = vsyncpa [#allocation3], 0  ;;  %s899_s0 = inlined_call_operand.hbm [shape: f32[2,4,2,128], index: 0, kind: input, shape index: {}]   ;;  %s900_s1 = inlined_call_operand.vmem [shape: f32[4,4], index: 1, kind: input, shape index: {}]   ;;  %s901_s2 = inlined_call_operand.vmem [shape: f32[4,1], index: 2, kind: input, shape index: {}]   ;;  %s902_s3 = inlined_call_operand.hbm [shape: f32[2,4,2,128], index: 3, kind: output, shape index: {}]  }
   0x1   :  { %10 = vsyncpa [#allocation3 + $0x1], 0 }
   0x2   :  { %11 = vsyncpa [#allocation4], 0 }
   0x3   :  { %13 = vsyncpa [#allocation4 + $0x1], 0  ;;  %s744_s12 = smov 0   ;;  %s746_s13 = smov 0  }
   0x4   :  { %s748_s14 = smov 0   ;;  %s750_s15 = smov 0  }
   0x5   :  { %s752_s16 = smov 0   ;;  %s754_s17 = smov 0  }
   0x6 LB: > { %s462_s18 = sadd.s32 4294967295, %s715_s17   ;;  %s463_s19 = sadd.s32 4294967294, %s715_s17   ;;  %s715_s17 = sphi %s754_s17, %s19_s17   ;;  %s711_s16 = sphi %s752_s16, %s911_s16   ;;  %s707_s15 = sphi %s750_s15, %s910_s15   ;;  %s703_s14 = sphi %s748_s14, %s909_s14   ;;  %s699_s13 = sphi %s746_s13, %s908_s13   ;;  %s695_s12 = sphi %s744_s12, %s907_s12  }
   0x7   : > { %s28_s20 = sadd.s32 1, %s711_s16  ;;  %s40_s21 = sadd.s32 1, %s703_s14 }
   0x8   : > { %p29_p0 = scmp.ge.s32.totalorder %s28_s20, 2  ;;  %p47_p1 = scmp.ne.s32.totalorder %s703_s14, %s699_s13 }
   0x9   : > { %p48_p2 = scmp.eq.s32.totalorder %s715_s17, 0  ;;  %p53_p3 = scmp.ne.s32.totalorder %s699_s13, %s695_s12 }
   0xa   : > { %s913_s20 = smov (%p29_p0, %s28_s20), 0  ;;  %p54_p5 = scmp.eq.s32.totalorder %s462_s18, 0 }
   0xb   : > { %p785_p4 = por %p48_p2, %p47_p1  ;;  %s35_s23 = ssub.s32 %s711_s16, %s913_s20 }
   0xc   : > { %p121_p6 = scmp.eq.s32.totalorder %s462_s18, 1  ;;  %p38_p7 = scmp.eq.s32.totalorder %s35_s23, 0 }
   0xd   : > { %p791_p8 = por %p54_p5, %p53_p3  ;;  %p127_p10 = scmp.eq.s32.totalorder %s463_s19, 1 }
   0xe   : > { %p795_p9 = por %p121_p6, %p47_p1  ;;  %p465_p12 = scmp.ge.s32.totalorder %s715_s17, 2 }
   0xf   : > { %s800_s26 = scalar_select %p38_p7, %s703_s14, %s40_s21  }
  0x10   : > { %p802_p11 = por %p127_p10, %p53_p3  ;;  %p546_p13 = scmp.lt.s32.totalorder %s715_s17, 2 }
  0x11   : > { %s153_s28 = sand.u32 1, %s703_s14   ;;  %s492_s30 = sshll.u32 %s711_s16, 3 }
  0x12   : > { %s466_s29 = sshll.u32 %s153_s28, 3  ;;  %s163_s6 = scalar_lea.hbm %s899_s0, %s492_s30 }
  0x13   : > { %s157_s7 = scalar_lea.vmem [#allocation2], %s466_s29  ;;  %s164_s9 = sshll.u32 %s163_s6, 4  ;;  %s165_s9 = int_to_ptr.hbm [resolvable:$true] %s164_s9 }
  0x14   : > { %s166_s8 = sshll.u32 %s157_s7, 4  ;;  %p539_p0 = pnand %p546_p13, %p785_p4  ;;  %s167_s8 = int_to_ptr.vmem [resolvable:$true] %s166_s8 }
  0x15   : > { %p469_p1 = scmp.ge.s32.totalorder %s715_s17, 1  ;;  %s154_s10 = scalar_lea.sflag [#allocation3], %s153_s28 }
  0x16   : > { %s717_s11 = smov 32   ;;  %s718_s18 = smov 2  }
  0x17   : > { %541 = dma.hbm_to_vmem [thread:$0]  (!%p539_p0), %s165_s9, 128, %s167_s8, %s154_s10, %s717_s11, %s717_s11, %s718_s18  }
  0x18   : > { %p174_p2 = scmp.lt.s32.totalorder %s715_s17, 3 }
  0x1a   : > { %p175_p3 = pnand %p469_p1, %p174_p2 }
  0x1b   : > { %s818_s19 = sand.u32 (!%p175_p3), 1, %s699_s13  }
  0x1c   : > { %178 = sbr.rel (%p175_p3) target bundleno = 237 (0xed), region = 32  ;;  %s470_s21 = sshll.u32 (!%p175_p3), %s818_s19, 3 }
  0x1d   : > { %s181_s23 = scalar_lea.sflag (!%p175_p3), [#allocation3], %s818_s19  ;;  %s824_s22 = scalar_lea.vmem (!%p175_p3), [#allocation2], %s470_s21 }
  0x21   : > { %686 = dma.done.wait (%p791_p8), %s181_s23, 128  }
  0x22   : > { %688 = vsyncadd (%p791_p8), %s181_s23, 4294967168  ;;  %v208_v0 = vld [vmem:[%s900_s1] sm:$0xf]  ;;  %s719_s30 = smov 125   ;;  %s720_s4 = smov 127  }
  0x23   : > { %241 = vrot.lane.b32.xlu1 %v208_v0, %s719_s30  ;;  %223 = vrot.lane.b32.xlu0 %v208_v0, %s720_s4  ;;  %v250_v1 = vrot.slane %v208_v0, 1  ;;  %494 = vpush %v208_v0  ;;  %s721_s5 = smov 126   ;;  %v287_v2 = vrot.slane %v208_v0, 2  ;;  %v324_v3 = vrot.slane %v208_v0, 3  ;;  %v209_v4 = vld [vmem:[%s901_s2] sm:$0xf] }
  0x24   : > { %496 = vpush %v209_v4  ;;  %v255_v11 = vrot.slane %v209_v4, 1  ;;  %v292_v12 = vrot.slane %v209_v4, 2  ;;  %v329_v16 = vrot.slane %v209_v4, 3  ;;  %v210_v20 = vld [vmem:[%s824_s22] sm:$0x3] }
  0x25   : > { %269 = vrot.lane.b32.xlu2 %v250_v1, %s721_s5  ;;  %v472_v24 = vld [vmem:[%s824_s22 + $0x2] sm:$0x3]  ;;  %v473_v28 = vld [vmem:[%s824_s22 + $0x4] sm:$0x3]  ;;  %v474_v30 = vld [vmem:[%s824_s22 + $0x6] sm:$0x3] }
  0x26   : > { %v249_v31 = vld [vmem:[%s824_s22] sm:$0x3]  ;;  %v475_v36 = vld [vmem:[%s824_s22 + $0x2] sm:$0x3]  ;;  %v476_v42 = vld [vmem:[%s824_s22 + $0x4] sm:$0x3] }
  0x27   : > { %v286_v47 = vld [vmem:[%s824_s22] sm:$0x3]  ;;  %v477_v48 = vld [vmem:[%s824_s22 + $0x6] sm:$0x3]  ;;  %v479_v53 = vld [vmem:[%s824_s22 + $0x2] sm:$0x3] }
  0x28   : > { %v480_v56 = vld [vmem:[%s824_s22 + $0x4] sm:$0x3]  ;;  %v481_v60 = vld [vmem:[%s824_s22 + $0x6] sm:$0x3] }
  0x2b   : > { %232 = vrot.lane.b32.xlu0 %v208_v0, %s721_s5  ;;  %261 = vrot.lane.b32.xlu1 %v250_v1, %s720_s4  ;;  %v323_v0 = vld [vmem:[%s824_s22] sm:$0x3] }
  0x2d   : > { %277 = vrot.lane.b32.xlu2 %v250_v1, %s719_s30 }
  0x33   : > { %298 = vrot.lane.b32.xlu0 %v287_v2, %s720_s4  ;;  %306 = vrot.lane.b32.xlu1 %v287_v2, %s721_s5 }
  0x35   : > { %314 = vrot.lane.b32.xlu2 %v287_v2, %s719_s30 }
  0x3b   : > { %335 = vrot.lane.b32.xlu0 %v324_v3, %s720_s4  ;;  %343 = vrot.lane.b32.xlu1 %v324_v3, %s721_s5  ;;  %s847_s5 = scalar_lea.vmem [#allocation5], %s470_s21 }
  0x3d   : > { %351 = vrot.lane.b32.xlu2 %v324_v3, %s719_s30 }
  0x54   : > { %s495_s7 = spop %494 }
  0x55   : > { %s497_s8 = spop %496  ;;  %v213_v21 = vstv %s495_s7 }
  0x56   : > { %v215_v22 = vmul.f32 %v213_v21, %v210_v20  ;;  %v218_v23 = vstv %s497_s8 }
  0x58   : > { %v220_v26 = vadd.f32 %v218_v23, %v215_v22 }
  0x7f   : > { %v270_v5 = vpop.permute.xlu2 %269 }
  0x87   : > { %v278_v8 = vpop.permute.xlu2 %277 }
  0x8f   : > { %v315_v13 = vpop.permute.xlu2 %314 }
  0x95   : > { %v242_v6 = vpop.permute.xlu1 %241  ;;  %v224_v7 = vpop.permute.xlu0 %223 }
  0x96   : > { %498 = vpush %v224_v7 }
  0x97   : > { %v352_v17 = vpop.permute.xlu2 %351 }
  0x9d   : > { %v233_v9 = vpop.permute.xlu0 %232  ;;  %v262_v10 = vpop.permute.xlu1 %261 }
  0x9e   : > { %500 = vpush %v233_v9 }
  0x9f   : > { %502 = vpush %v242_v6 }
  0xa0   : > { %504 = vpush %v250_v1 }
  0xa1   : > { %506 = vpush %v255_v11 }
  0xa2   : > { %508 = vpush %v262_v10  ;;  %v483_v10 = vld [vmem:[%s824_s22 + $0x2] sm:$0x3] }
  0xa3   : > { %510 = vpush %v270_v5 }
  0xa4   : > { %512 = vpush %v278_v8 }
  0xa5   : > { %514 = vpush %v287_v2  ;;  %v299_v14 = vpop.permute.xlu0 %298  ;;  %v307_v15 = vpop.permute.xlu1 %306 }
  0xa6   : > { %516 = vpush %v292_v12  ;;  %v484_v12 = vld [vmem:[%s824_s22 + $0x4] sm:$0x3] }
  0xa7   : > { %518 = vpush %v299_v14 }
  0xa8   : > { %520 = vpush %v307_v15  ;;  %v485_v15 = vld [vmem:[%s824_s22 + $0x6] sm:$0x3]  ;;  %s361_s22 = scalar_lea.sflag [#allocation4], %s818_s19 }
  0xa9   : > { %522 = vpush %v315_v13 }
  0xaa   : > { %524 = vpush %v324_v3 }
  0xab   : > { %526 = vpush %v329_v16 }
  0xad   : > { %v336_v18 = vpop.permute.xlu0 %335  ;;  %v344_v19 = vpop.permute.xlu1 %343 }
  0xae   : > { %528 = vpush %v336_v18 }
  0xaf   : > { %530 = vpush %v344_v19 }
  0xb0   : > { %532 = vpush %v352_v17 }
  0xc7   : > { %s499_s9 = spop %498 }
  0xc8   : > { %v226_v25 = vstv %s499_s9 }
  0xc9   : > { %v228_v27 = vmul.f32 %v472_v24, %v226_v25 }
  0xcb   : > { %v229_v32 = vadd.f32 %v228_v27, %v220_v26 }
  0xcf   : > { %s501_s10 = spop %500 }
  0xd0   : > { %v235_v29 = vstv %s501_s10  ;;  %s503_s11 = spop %502  ;;  %s493_s10 = sshll.u32 %s707_s15, 3 }
  0xd1   : > { %v237_v33 = vmul.f32 %v473_v28, %v235_v29  ;;  %v244_v34 = vstv %s503_s11  ;;  %s505_s18 = spop %504 }
  0xd2   : > { %v252_v35 = vstv %s505_s18  ;;  %s507_s23 = spop %506  ;;  %v246_v38 = vmul.f32 %v474_v30, %v244_v34 }
  0xd3   : > { %v238_v37 = vadd.f32 %v237_v33, %v229_v32  ;;  %v254_v39 = vmul.f32 %v252_v35, %v249_v31  ;;  %v257_v40 = vstv %s507_s23  ;;  %s509_s28 = spop %508 }
  0xd4   : > { %v264_v41 = vstv %s509_s28  ;;  %s511_s29 = spop %510 }
  0xd5   : > { %v247_v43 = vadd.f32 %v246_v38, %v238_v37  ;;  %v259_v44 = vadd.f32 %v257_v40, %v254_v39  ;;  %v266_v45 = vmul.f32 %v475_v36, %v264_v41  ;;  %v272_v46 = vstv %s511_s29  ;;  %s513_s30 = spop %512 }
  0xd6   : > { %v280_v49 = vstv %s513_s30  ;;  %s515_s4 = spop %514  ;;  %v274_v51 = vmul.f32 %v476_v42, %v272_v46  ;;  %s373_s30 = scalar_lea.hbm %s902_s3, %s493_s10 }
  0xd7   : > { %248 = vst [vmem:[%s847_s5] sm:$0x3] %v247_v43  ;;  %v267_v50 = vadd.f32 %v266_v45, %v259_v44  ;;  %v289_v52 = vstv %s515_s4  ;;  %s517_s24 = spop %516  ;;  %v282_v58 = vmul.f32 %v477_v48, %v280_v49  ;;  %s374_s4 = sshll.u32 %s847_s5, 4  ;;  %s375_s4 = int_to_ptr.vmem [resolvable:$true] %s374_s4 }
  0xd8   : > { %v291_v54 = vmul.f32 %v289_v52, %v286_v47  ;;  %v294_v55 = vstv %s517_s24  ;;  %s519_s6 = spop %518  ;;  %s376_s15 = sshll.u32 %s373_s30, 4  ;;  %s377_s15 = int_to_ptr.hbm [resolvable:$true] %s376_s15 }
  0xd9   : > { %v275_v57 = vadd.f32 %v274_v51, %v267_v50  ;;  %v301_v59 = vstv %s519_s6  ;;  %s521_s7 = spop %520  ;;  %s647_s24 = sshra.s32 %s377_s15, 4  ;;  %s648_s24 = int_to_ptr.hbm [resolvable:$true] %s647_s24 }
  0xda   : > { %v296_v61 = vadd.f32 %v294_v55, %v291_v54  ;;  %v303_v62 = vmul.f32 %v479_v53, %v301_v59  ;;  %v309_v63 = vstv %s521_s7  ;;  %s523_s21 = spop %522  ;;  %s649_s6 = scalar_lea.hbm %s648_s24, 8 }
  0xdb   : > { %v283_v1 = vadd.f32 %v282_v58, %v275_v57  ;;  %v311_v2 = vmul.f32 %v480_v56, %v309_v63  ;;  %v317_v3 = vstv %s523_s21  ;;  %s525_s8 = spop %524  ;;  %p650_p4 = scmp.ne.s32.totalorder %s648_s24, %s649_s6 }
  0xdc   : > { %v304_v4 = vadd.f32 %v303_v62, %v296_v61  ;;  %v319_v5 = vmul.f32 %v481_v60, %v317_v3  ;;  %v326_v6 = vstv %s525_s8  ;;  %s527_s9 = spop %526  ;;  %s653_s8 = scalar_lea.hbm %s902_s3, 16 }
  0xdd   : > { %478 = vst [vmem:[%s847_s5 + $0x2] sm:$0x3] %v283_v1  ;;  %v328_v7 = vmul.f32 %v326_v6, %v323_v0  ;;  %v331_v8 = vstv %s527_s9  ;;  %p651_p5 = pnand %p650_p4, %p795_p9  ;;  %p654_p7 = scmp.lt.s32.totalorder %s648_s24, %s902_s3 }
  0xde   : > { %v312_v9 = vadd.f32 %v311_v2, %v304_v4  ;;  %p655_p8 = scmp.lt.s32.totalorder %s653_s8, %s649_s6 }
  0xdf   : > { %v333_v11 = vadd.f32 %v331_v8, %v328_v7  ;;  %s529_s11 = spop %528  ;;  %p652_p6 = pneg %p651_p5 }
  0xe0   : > { %v320_v13 = vadd.f32 %v319_v5, %v312_v9  ;;  %v338_v14 = vstv %s529_s11  ;;  %s531_s18 = spop %530  ;;  %p656_p10 = por %p655_p8, %p654_p7 }
  0xe1   : > { %v340_v16 = vmul.f32 %v483_v10, %v338_v14  ;;  %v346_v17 = vstv %s531_s18  ;;  %s533_s23 = spop %532 }
  0xe2   : > { %482 = vst [vmem:[%s847_s5 + $0x4] sm:$0x3] %v320_v13  ;;  %v348_v18 = vmul.f32 %v484_v12, %v346_v17  ;;  %v354_v19 = vstv %s533_s23  ;;  %p657_p13 = pnand %p656_p10, %p652_p6 }
  0xe3   : > { %v341_v20 = vadd.f32 %v340_v16, %v333_v11  ;;  %v356_v21 = vmul.f32 %v485_v15, %v354_v19 }
  0xe5   : > { %v349_v22 = vadd.f32 %v348_v18, %v341_v20 }
  0xe7   : > { %v357_v23 = vadd.f32 %v356_v21, %v349_v22 }
  0xe9   : > { %486 = vst [vmem:[%s847_s5 + $0x6] sm:$0x3] %v357_v23 }
  0xea   : > { %660 = shalt.err (!%p657_p13)
}
  0xeb   : > { %s722_s19 = smov 32   ;;  %s723_s5 = smov 2  }
  0xec   : > { %536 = dma.vmem_to_hbm [thread:$0]  (%p795_p9), %s375_s4, 128, %s377_s15, %s361_s22, %s722_s19, %s722_s19, %s723_s5  }
  0xed PF: > { %s391_s11 = sand.u32 1, %s695_s12   ;;  %p543_p0 = pnand %p465_p12, %p802_p11 }
  0xee   : > { %s392_s18 = scalar_lea.sflag [#allocation4], %s391_s11 }
  0xef   : > { %p544_p1 = pneg %p543_p0 }
  0xf1   : > { %690 = dma.done.wait (%p544_p1), %s392_s18, 128  }
  0xf2   : > { %692 = vsyncadd (%p544_p1), %s392_s18, 4294967168  ;;  %s19_s17 = sadd.s32 1, %s715_s17   ;;  %s907_s12 = smov %s699_s13 }
  0xf3   : > { %p16_p2 = scmp.ge.s32.totalorder %s19_s17, 4   ;;  %s908_s13 = smov %s703_s14 }
  0xf4   : > { %s909_s14 = smov %s800_s26  ;;  %s910_s15 = smov %s711_s16 }
  0xf5   : > { %s911_s16 = smov %s913_s20  ;;  %18 = sbr.rel (!%p16_p2) target bundleno = 6 (0x6), region = 83 }
  0xfa   :  { %398 = vsyncpa [#allocation3], 1 }
  0xfb   :  { %400 = vsyncpa [#allocation3 + $0x1], 1 }
  0xfc   :  { %401 = vsyncpa [#allocation4], 1 }
  0xfd   :  { %403 = vsyncpa [#allocation4 + $0x1], 1 }

</bundles_post_ra>
